<compile_context>
chip_gen: v5e
topology: v5e:2x2
jax: 0.10.0
libtpu: 0.0.40
codegen_flags: <defaults>
</compile_context>

<pallas_src>
import functools

import jax
import jax.numpy as jnp
from jax import lax
from jax.experimental import pallas as pl
from jax.experimental.pallas import tpu as pltpu


# ---------------------------------------------------------------------------
# Helpers.
# ---------------------------------------------------------------------------
def _sigmoid_via_tanh(x):
    # sigmoid(x) == 0.5 * (tanh(0.5 * x) + 1): one EUP transcendental instead
    # of exp + reciprocal.
    return 0.5 * (jnp.tanh(0.5 * x) + 1.0)


def _largest_divisor_leq(n, cap):
    for d in range(min(cap, n), 0, -1):
        if n % d == 0:
            return d
    return 1


# ---------------------------------------------------------------------------
# Input projection kernel: xparts = x @ Wx + b  over all T*B rows at once.
# ---------------------------------------------------------------------------
def _input_proj_kernel(x_ref, wx_ref, b_ref, out_ref):
    wx = wx_ref[...]
    acc = jnp.dot(x_ref[...].astype(wx.dtype), wx,
                  preferred_element_type=jnp.float32)
    out_ref[...] = (acc + b_ref[...].astype(jnp.float32)).astype(out_ref.dtype)


def _input_projection(xs, wx, b, *, row_block):
    """xs: (T, B, Dx) -> (T, B, 3H) f32, computed as one batched matmul."""
    T, B, Dx = xs.shape
    H3 = wx.shape[-1]
    rows = T * B
    if rows % row_block != 0 or (row_block % 8 != 0 and row_block != rows):
        row_block = rows
    x2d = xs.reshape(rows, Dx)
    out = pl.pallas_call(
        _input_proj_kernel,
        grid=(rows // row_block,),
        out_shape=jax.ShapeDtypeStruct((rows, H3), jnp.float32),
        in_specs=[
            pl.BlockSpec((row_block, Dx), lambda i: (i, 0)),
            pl.BlockSpec((Dx, H3), lambda i: (0, 0)),     # Wx resident
            pl.BlockSpec((1, H3), lambda i: (0, 0)),      # bias resident
        ],
        out_specs=pl.BlockSpec((row_block, H3), lambda i: (i, 0)),
        compiler_params=pltpu.CompilerParams(dimension_semantics=("parallel",)),
    )(x2d, wx, b)
    return out.reshape(T, B, H3)


# ---------------------------------------------------------------------------
# Recurrent sequence kernel: TT time steps per grid iteration.
# ---------------------------------------------------------------------------
def _gru_seq_kernel(xp_ref, h0_ref, wh_ref, *rest, norm, update_bias,
                    time_block):
    if norm:
        g_ref, be_ref, out_ref, h_scr = rest
    else:
        out_ref, h_scr = rest
        g_ref = be_ref = None

    # Re-initialize the carried state at the first time-block of this batch
    # block (time is the last grid axis -> innermost loop).
    @pl.when(pl.program_id(1) == 0)
    def _():
        h_scr[...] = h0_ref[...].astype(jnp.float32)

    wh = wh_ref[...]
    TB, H = out_ref.shape[1], out_ref.shape[2]
    H3 = 3 * H

    # Hoisted out of the unrolled time loop (JAX does not CSE these).
    if norm:
        gamma = jnp.broadcast_to(g_ref[...].astype(jnp.float32), (TB, H3))
        beta = jnp.broadcast_to(be_ref[...].astype(jnp.float32), (TB, H3))
    ub = jnp.float32(update_bias)

    def step(t, state):
        # Only the serially-dependent part of the projection runs here.
        parts = xp_ref[t].astype(jnp.float32)
        parts = parts + jnp.dot(state.astype(wh.dtype), wh,
                                preferred_element_type=jnp.float32)
        if norm:
            mu = jnp.mean(parts, axis=-1, keepdims=True)
            var = jnp.mean(jnp.square(parts - mu), axis=-1, keepdims=True)
            parts = (parts - mu) * lax.rsqrt(var + 1e-5)
            parts = parts * gamma + beta
        reset = _sigmoid_via_tanh(parts[:, 0:H])
        cand = jnp.tanh(reset * parts[:, H:2 * H])
        update = _sigmoid_via_tanh(parts[:, 2 * H:3 * H] + ub)
        new_h = update * cand + (1.0 - update) * state
        out_ref[t] = new_h.astype(out_ref.dtype)   # single rounding from f32
        return new_h                               # f32 carry, stays in vregs

    h_scr[...] = lax.fori_loop(0, time_block, step, h_scr[...], unroll=True)


def gru_cell_sequence(xs, h0, params, *, norm=False, update_bias=-1.0,
                      time_block=None, batch_block=None):
    """Run T GRUCell steps.  xs: (T, B, Dx), h0: (B, H).
    Returns (trajectory (T, B, H), last hidden state (B, H))."""
    T, B, Dx = xs.shape
    H = h0.shape[-1]
    H3 = 3 * H

    TT = time_block if time_block is not None else _largest_divisor_leq(T, 8)
    if T % TT != 0:
        TT = _largest_divisor_leq(T, TT)
    TB = batch_block if batch_block is not None else B
    if B % TB != 0 or (TB % 8 != 0 and TB != B):
        TB = B

    # Time-invariant projection hoisted out of the recurrence (bias folded in).
    xparts = _input_projection(xs, params["wx"], params["b"], row_block=TT * B)

    inputs = [xparts, h0, params["wh"]]
    in_specs = [
        pl.BlockSpec((TT, TB, H3), lambda b, t: (t, b, 0)),   # streamed per block
        pl.BlockSpec((TB, H), lambda b, t: (b, 0)),           # h0 per batch block
        pl.BlockSpec((H, H3), lambda b, t: (0, 0)),           # Wh: VMEM-resident
    ]
    if norm:
        inputs += [params["gamma"], params["beta"]]
        in_specs += [pl.BlockSpec((1, H3), lambda b, t: (0, 0))] * 2

    kernel = functools.partial(_gru_seq_kernel, norm=norm,
                               update_bias=float(update_bias), time_block=TT)

    outs = pl.pallas_call(
        kernel,
        grid=(B // TB, T // TT),
        out_shape=jax.ShapeDtypeStruct((T, B, H), xs.dtype),
        in_specs=in_specs,
        out_specs=pl.BlockSpec((TT, TB, H), lambda b, t: (t, b, 0)),
        scratch_shapes=[pltpu.VMEM((TB, H), jnp.float32)],    # carried hidden state
        compiler_params=pltpu.CompilerParams(
            dimension_semantics=("parallel", "arbitrary")),
    )(*inputs)
    return outs, outs[-1]


# ---------------------------------------------------------------------------
# Single-step kernel (matches the torch module's forward; not for hot loops).
# ---------------------------------------------------------------------------
def _gru_step_kernel(x_ref, h_ref, wx_ref, wh_ref, b_ref, *rest,
                     norm, update_bias):
    if norm:
        g_ref, be_ref, out_ref = rest
    else:
        (out_ref,) = rest
        g_ref = be_ref = None

    wx, wh = wx_ref[...], wh_ref[...]
    state = h_ref[...]
    H = out_ref.shape[-1]

    parts = jnp.dot(x_ref[...].astype(wx.dtype), wx,
                    preferred_element_type=jnp.float32)
    parts = parts + jnp.dot(state.astype(wh.dtype), wh,
                            preferred_element_type=jnp.float32)
    parts = parts + b_ref[...].astype(jnp.float32)
    if norm:
        mu = jnp.mean(parts, axis=-1, keepdims=True)
        var = jnp.mean(jnp.square(parts - mu), axis=-1, keepdims=True)
        parts = (parts - mu) * lax.rsqrt(var + 1e-5)
        parts = parts * g_ref[...].astype(jnp.float32) + be_ref[...].astype(jnp.float32)

    reset = _sigmoid_via_tanh(parts[:, 0:H])
    cand = jnp.tanh(reset * parts[:, H:2 * H])
    update = _sigmoid_via_tanh(parts[:, 2 * H:3 * H] + jnp.float32(update_bias))
    new_h = update * cand + (1.0 - update) * state.astype(jnp.float32)
    out_ref[...] = new_h.astype(out_ref.dtype)


def gru_cell_forward(x, h, params, *, norm=False, update_bias=-1.0):
    """Single GRUCell step.  Returns (output, output) like the torch module."""
    B = x.shape[0]
    H = h.shape[-1]
    inputs = [x, h, params["wx"], params["wh"], params["b"]]
    if norm:
        inputs += [params["gamma"], params["beta"]]

    kernel = functools.partial(_gru_step_kernel, norm=norm,
                               update_bias=float(update_bias))
    # Alias h -> output only when dtypes match (otherwise the alias is invalid).
    aliases = {1: 0} if h.dtype == x.dtype else {}

    out = pl.pallas_call(
        kernel,
        out_shape=jax.ShapeDtypeStruct((B, H), x.dtype),
        in_specs=[pl.BlockSpec(memory_space=pltpu.VMEM)] * len(inputs),
        out_specs=pl.BlockSpec(memory_space=pltpu.VMEM),
        input_output_aliases=aliases,
    )(*inputs)
    return out, out


# ---------------------------------------------------------------------------
# Parameter prep: done ONCE at module init, not per step.
# ---------------------------------------------------------------------------
def prepare_gru_params(weight, bias, ln_gamma=None, ln_beta=None, *,
                       input_size, param_dtype=None):
    """weight: (3H, input+hidden) torch nn.Linear layout; bias: (3H,).
    param_dtype=jnp.bfloat16 stores Wx/Wh in bf16 (MXU rate); gate math stays f32."""
    w_t = weight.T                                   # (D, 3H)
    cast = (lambda a: a.astype(param_dtype)) if param_dtype is not None else (lambda a: a)
    params = {
        "wx": cast(w_t[:input_size]),                # (input_size, 3H)
        "wh": cast(w_t[input_size:]),                # (hidden_size, 3H)
        "b": bias[None, :].astype(jnp.float32),      # bias added in f32
    }
    if ln_gamma is not None:
        params["gamma"] = ln_gamma[None, :].astype(jnp.float32)
        params["beta"] = ln_beta[None, :].astype(jnp.float32)
    return params


# ---------------------------------------------------------------------------
# Pure-JAX references mirroring the torch forward.
# ---------------------------------------------------------------------------
def _gru_ref_step(x, h, params, *, norm, update_bias):
    parts = x @ params["wx"] + h @ params["wh"] + params["b"]
    if norm:
        p = parts.astype(jnp.float32)
        mu = p.mean(-1, keepdims=True)
        var = ((p - mu) ** 2).mean(-1, keepdims=True)
        p = (p - mu) / jnp.sqrt(var + 1e-5) * params["gamma"] + params["beta"]
        parts = p.astype(x.dtype)
    H = h.shape[-1]
    reset = jax.nn.sigmoid(parts[:, :H])
    cand = jnp.tanh(reset * parts[:, H:2 * H])
    update = jax.nn.sigmoid(parts[:, 2 * H:] + update_bias)
    return update * cand + (1.0 - update) * h


def _gru_ref_sequence(xs, h0, params, *, norm, update_bias):
    def step(hc, xt):
        hn = _gru_ref_step(xt, hc, params, norm=norm, update_bias=update_bias)
        return hn, hn
    _, outs = lax.scan(step, h0, xs)
    return outs


# ---------------------------------------------------------------------------
# Demo / correctness check.
# ---------------------------------------------------------------------------
if __name__ == "__main__":
    B = 16
    INPUT_SIZE = 128
    HIDDEN_SIZE = 128          # multiple of 128 -> lane-dense gates and output
    T = 8
    UPDATE_BIAS = -1.0

    key = jax.random.PRNGKey(0)
    kx, kh, kxs, kw, kb, kg, kbe = jax.random.split(key, 7)

    x = jax.random.normal(kx, (B, INPUT_SIZE), dtype=jnp.float32)
    h = jax.random.normal(kh, (B, HIDDEN_SIZE), dtype=jnp.float32)
    xs = jax.random.normal(kxs, (T, B, INPUT_SIZE), dtype=jnp.float32)

    # Deterministic nn.Linear-style init: U(-1/sqrt(fan_in), 1/sqrt(fan_in)).
    fan_in = INPUT_SIZE + HIDDEN_SIZE
    bound = 1.0 / (fan_in ** 0.5)
    weight = jax.random.uniform(kw, (3 * HIDDEN_SIZE, fan_in),
                                minval=-bound, maxval=bound, dtype=jnp.float32)
    bias = jax.random.uniform(kb, (3 * HIDDEN_SIZE,),
                              minval=-bound, maxval=bound, dtype=jnp.float32)
    ln_gamma = 1.0 + 0.1 * jax.random.normal(kg, (3 * HIDDEN_SIZE,), jnp.float32)
    ln_beta = 0.05 * jax.random.normal(kbe, (3 * HIDDEN_SIZE,), jnp.float32)

    params_norm = prepare_gru_params(weight, bias, ln_gamma, ln_beta,
                                     input_size=INPUT_SIZE)
    params_plain = prepare_gru_params(weight, bias, input_size=INPUT_SIZE)
    params_bf16 = prepare_gru_params(weight, bias, ln_gamma, ln_beta,
                                     input_size=INPUT_SIZE,
                                     param_dtype=jnp.bfloat16)

    # References (pure JAX).
    ref_norm = _gru_ref_step(x, h, params_norm, norm=True, update_bias=UPDATE_BIAS)
    ref_plain = _gru_ref_step(x, h, params_plain, norm=False, update_bias=UPDATE_BIAS)
    ref_seq = _gru_ref_sequence(xs, h, params_norm, norm=True, update_bias=UPDATE_BIAS)
    ref_seq_plain = _gru_ref_sequence(xs, h, params_plain, norm=False,
                                      update_bias=UPDATE_BIAS)

    # Pallas kernels.
    out_norm, out_norm2 = gru_cell_forward(x, h, params_norm, norm=True,
                                           update_bias=UPDATE_BIAS)
    out_plain, _ = gru_cell_forward(x, h, params_plain, norm=False,
                                    update_bias=UPDATE_BIAS)
    # Sequence: 2 batch blocks (parallel axis) x 2 time blocks of 4 unrolled steps.
    seq_out, seq_last = gru_cell_sequence(xs, h, params_norm, norm=True,
                                          update_bias=UPDATE_BIAS,
                                          time_block=4, batch_block=8)
    seq_plain, _ = gru_cell_sequence(xs, h, params_plain, norm=False,
                                     update_bias=UPDATE_BIAS,
                                     time_block=4, batch_block=8)
    # bf16 weights (f32 gate math); compared loosely against the f32 reference.
    seq_bf16, _ = gru_cell_sequence(xs, h, params_bf16, norm=True,
                                    update_bias=UPDATE_BIAS,
                                    time_block=4, batch_block=8)
    jax.block_until_ready((out_norm, out_plain, seq_out, seq_plain,
                           seq_bf16, seq_last))

    assert out_norm.shape == (B, HIDDEN_SIZE)
    assert out_norm2.shape == (B, HIDDEN_SIZE)
    assert seq_out.shape == (T, B, HIDDEN_SIZE)
    assert jnp.allclose(out_norm, ref_norm, atol=1e-4, rtol=1e-4), "norm=True mismatch"
    assert jnp.allclose(out_plain, ref_plain, atol=1e-4, rtol=1e-4), "norm=False mismatch"
    assert jnp.allclose(seq_out, ref_seq, atol=2e-4, rtol=2e-4), "sequence mismatch"
    assert jnp.allclose(seq_last, ref_seq[-1], atol=2e-4, rtol=2e-4), "sequence last mismatch"
    assert jnp.allclose(seq_plain, ref_seq_plain, atol=2e-4, rtol=2e-4), "plain sequence mismatch"
    assert jnp.allclose(seq_bf16, ref_seq, atol=0.1, rtol=0.1), "bf16-weight sequence mismatch"

    print("KERNEL_OK")
</pallas_src>

<mosaic_0001>
module attributes {stable_mosaic.version = 11 : i64} {
  func.func @_gru_step_kernel(%arg0: memref<16x128xf32, #tpu.memory_space<vmem>>, %arg1: memref<16x128xf32, #tpu.memory_space<vmem>>, %arg2: memref<128x384xf32, #tpu.memory_space<vmem>>, %arg3: memref<128x384xf32, #tpu.memory_space<vmem>>, %arg4: memref<1x384xf32, #tpu.memory_space<vmem>>, %arg5: memref<1x384xf32, #tpu.memory_space<vmem>>, %arg6: memref<1x384xf32, #tpu.memory_space<vmem>>, %arg7: memref<16x128xf32, #tpu.memory_space<vmem>>) attributes {dimension_semantics = [], scalar_prefetch = 0 : i64, scratch_operands = 0 : i64, tpu.core_type = #tpu.core_type<tc>} {
    %c0 = arith.constant 0 : index
    %c0_0 = arith.constant 0 : index
    %0 = vector.load %arg2[%c0, %c0_0] : memref<128x384xf32, #tpu.memory_space<vmem>>, vector<128x384xf32>
    %c0_1 = arith.constant 0 : index
    %c0_2 = arith.constant 0 : index
    %1 = vector.load %arg3[%c0_1, %c0_2] : memref<128x384xf32, #tpu.memory_space<vmem>>, vector<128x384xf32>
    %c0_3 = arith.constant 0 : index
    %c0_4 = arith.constant 0 : index
    %2 = vector.load %arg1[%c0_3, %c0_4] : memref<16x128xf32, #tpu.memory_space<vmem>>, vector<16x128xf32>
    %c0_5 = arith.constant 0 : index
    %c0_6 = arith.constant 0 : index
    %3 = vector.load %arg0[%c0_5, %c0_6] : memref<16x128xf32, #tpu.memory_space<vmem>>, vector<16x128xf32>
    %cst = arith.constant dense<0.000000e+00> : vector<16x384xf32>
    %4 = tpu.matmul %3, %0, %cst {dimension_numbers = #tpu.dot_dimension_numbers<[1], [0], [0], [1], [0, 0, 1, 1], [], []>} : vector<16x128xf32>, vector<128x384xf32>, vector<16x384xf32> -> vector<16x384xf32>
    %cst_7 = arith.constant dense<0.000000e+00> : vector<16x384xf32>
    %5 = tpu.matmul %2, %1, %cst_7 {dimension_numbers = #tpu.dot_dimension_numbers<[1], [0], [0], [1], [0, 0, 1, 1], [], []>} : vector<16x128xf32>, vector<128x384xf32>, vector<16x384xf32> -> vector<16x384xf32>
    %6 = arith.addf %4, %5 : vector<16x384xf32>
    %c0_8 = arith.constant 0 : index
    %c0_9 = arith.constant 0 : index
    %7 = vector.load %arg4[%c0_8, %c0_9] : memref<1x384xf32, #tpu.memory_space<vmem>>, vector<1x384xf32>
    %8 = vector.broadcast %7 : vector<1x384xf32> to vector<16x384xf32>
    %9 = arith.addf %6, %8 : vector<16x384xf32>
    %cst_10 = arith.constant dense<0.000000e+00> : vector<16xf32>
    %10 = vector.multi_reduction <add>, %9, %cst_10 [1] : vector<16x384xf32> to vector<16xf32>
    %11 = vector.shape_cast %10 : vector<16xf32> to vector<16x1xf32>
    %cst_11 = arith.constant 3.840000e+02 : f32
    %12 = vector.broadcast %cst_11 : f32 to vector<16x1xf32>
    %13 = arith.divf %11, %12 : vector<16x1xf32>
    %14 = vector.broadcast %13 : vector<16x1xf32> to vector<16x384xf32>
    %15 = arith.subf %9, %14 : vector<16x384xf32>
    %16 = arith.mulf %15, %15 : vector<16x384xf32>
    %cst_12 = arith.constant dense<0.000000e+00> : vector<16xf32>
    %17 = vector.multi_reduction <add>, %16, %cst_12 [1] : vector<16x384xf32> to vector<16xf32>
    %18 = vector.shape_cast %17 : vector<16xf32> to vector<16x1xf32>
    %cst_13 = arith.constant 3.840000e+02 : f32
    %19 = vector.broadcast %cst_13 : f32 to vector<16x1xf32>
    %20 = arith.divf %18, %19 : vector<16x1xf32>
    %21 = vector.broadcast %13 : vector<16x1xf32> to vector<16x384xf32>
    %22 = arith.subf %9, %21 : vector<16x384xf32>
    %cst_14 = arith.constant 9.99999974E-6 : f32
    %23 = vector.broadcast %cst_14 : f32 to vector<16x1xf32>
    %24 = arith.addf %20, %23 : vector<16x1xf32>
    %25 = math.rsqrt %24 : vector<16x1xf32>
    %26 = vector.broadcast %25 : vector<16x1xf32> to vector<16x384xf32>
    %27 = arith.mulf %22, %26 : vector<16x384xf32>
    %c0_15 = arith.constant 0 : index
    %c0_16 = arith.constant 0 : index
    %28 = vector.load %arg5[%c0_15, %c0_16] : memref<1x384xf32, #tpu.memory_space<vmem>>, vector<1x384xf32>
    %29 = vector.broadcast %28 : vector<1x384xf32> to vector<16x384xf32>
    %30 = arith.mulf %27, %29 : vector<16x384xf32>
    %c0_17 = arith.constant 0 : index
    %c0_18 = arith.constant 0 : index
    %31 = vector.load %arg6[%c0_17, %c0_18] : memref<1x384xf32, #tpu.memory_space<vmem>>, vector<1x384xf32>
    %32 = vector.broadcast %31 : vector<1x384xf32> to vector<16x384xf32>
    %33 = arith.addf %30, %32 : vector<16x384xf32>
    %34 = vector.extract_strided_slice %33 {offsets = [0, 0], sizes = [16, 128], strides = [1, 1]} : vector<16x384xf32> to vector<16x128xf32>
    %cst_19 = arith.constant 5.000000e-01 : f32
    %35 = vector.broadcast %cst_19 : f32 to vector<16x128xf32>
    %36 = arith.mulf %35, %34 : vector<16x128xf32>
    %37 = math.tanh %36 : vector<16x128xf32>
    %cst_20 = arith.constant 1.000000e+00 : f32
    %38 = vector.broadcast %cst_20 : f32 to vector<16x128xf32>
    %39 = arith.addf %37, %38 : vector<16x128xf32>
    %cst_21 = arith.constant 5.000000e-01 : f32
    %40 = vector.broadcast %cst_21 : f32 to vector<16x128xf32>
    %41 = arith.mulf %40, %39 : vector<16x128xf32>
    %42 = vector.extract_strided_slice %33 {offsets = [0, 128], sizes = [16, 128], strides = [1, 1]} : vector<16x384xf32> to vector<16x128xf32>
    %43 = arith.mulf %41, %42 : vector<16x128xf32>
    %44 = math.tanh %43 : vector<16x128xf32>
    %45 = vector.extract_strided_slice %33 {offsets = [0, 256], sizes = [16, 128], strides = [1, 1]} : vector<16x384xf32> to vector<16x128xf32>
    %cst_22 = arith.constant -1.000000e+00 : f32
    %46 = vector.broadcast %cst_22 : f32 to vector<16x128xf32>
    %47 = arith.addf %45, %46 : vector<16x128xf32>
    %cst_23 = arith.constant 5.000000e-01 : f32
    %48 = vector.broadcast %cst_23 : f32 to vector<16x128xf32>
    %49 = arith.mulf %48, %47 : vector<16x128xf32>
    %50 = math.tanh %49 : vector<16x128xf32>
    %cst_24 = arith.constant 1.000000e+00 : f32
    %51 = vector.broadcast %cst_24 : f32 to vector<16x128xf32>
    %52 = arith.addf %50, %51 : vector<16x128xf32>
    %cst_25 = arith.constant 5.000000e-01 : f32
    %53 = vector.broadcast %cst_25 : f32 to vector<16x128xf32>
    %54 = arith.mulf %53, %52 : vector<16x128xf32>
    %55 = arith.mulf %54, %44 : vector<16x128xf32>
    %cst_26 = arith.constant 1.000000e+00 : f32
    %56 = vector.broadcast %cst_26 : f32 to vector<16x128xf32>
    %57 = arith.subf %56, %54 : vector<16x128xf32>
    %58 = arith.mulf %57, %2 : vector<16x128xf32>
    %59 = arith.addf %55, %58 : vector<16x128xf32>
    %c0_27 = arith.constant 0 : index
    %c0_28 = arith.constant 0 : index
    %60 = vector.load %arg7[%c0_27, %c0_28] : memref<16x128xf32, #tpu.memory_space<vmem>>, vector<16x128xf32>
    tpu.vector_store %arg7[%c0_27, %c0_28], %59 {strides = array<i32>} : memref<16x128xf32, #tpu.memory_space<vmem>>, vector<16x128xf32>,
    return
  }
}

</mosaic_0001>

<bundles_post_ra>
// kernel: tpu_custom_call.1
= control target key start
LH: loop header
LB: loop body
LE: loop exit
PB: predicated region body
PF: predicated region fallthrough
CT: control target
= control target key end

     0   :  { %12 = vsyncpa [#allocation3], 0  ;;  %s743_s0 = inlined_call_operand.vmem [shape: f32[16,128], index: 0, kind: input, shape index: {}]   ;;  %s744_s1 = inlined_call_operand.hbm [shape: f32[16,128], index: 1, kind: input, shape index: {}, may-alias: {1,7}]   ;;  %s745_s2 = inlined_call_operand.hbm [shape: f32[128,384], index: 2, kind: input, shape index: {}]   ;;  %s746_s3 = inlined_call_operand.hbm [shape: f32[128,384], index: 3, kind: input, shape index: {}]   ;;  %s747_s4 = inlined_call_operand.vmem [shape: f32[1,384], index: 4, kind: input, shape index: {}]   ;;  %s748_s5 = inlined_call_operand.vmem [shape: f32[1,384], index: 5, kind: input, shape index: {}]   ;;  %s749_s6 = inlined_call_operand.vmem [shape: f32[1,384], index: 6, kind: input, shape index: {}]   ;;  %s750_s7 = inlined_call_operand.hbm [shape: f32[16,128], index: 7, kind: output, shape index: {}, may-alias: {1,7}]  }
   0x1   :  { %13 = vsyncpa [#allocation6], 0  ;;  %s34_s26 = sshll.u32 %s745_s2, 4  ;;  %s35_s26 = int_to_ptr.hbm [resolvable:$true] %s34_s26 }
   0x2   :  { %14 = vsyncpa [#allocation4], 0  ;;  %s634_s27 = smov [#allocation5]   ;;  %s21_s8 = sshll.u32 %s744_s1, 4  ;;  %s22_s8 = int_to_ptr.hbm [resolvable:$true] %s21_s8 }
   0x3   :  { %s36_s28 = sshll.u32 %s634_s27, 4  ;;  %s635_s9 = smov 384   ;;  %s37_s28 = int_to_ptr.vmem [resolvable:$true] %s36_s28 }
   0x4   :  { %s636_s10 = smov 24   ;;  %s637_s11 = smov [#allocation2]  }
   0x5   :  { %42 = dma.hbm_to_vmem [thread:$0]  %s35_s26, 6144, %s37_s28, [#allocation6], %s635_s9, %s635_s9, %s636_s10  }
   0x6   :  { %s23_s12 = sshll.u32 %s637_s11, 4  ;;  %s638_s13 = smov 128   ;;  %s24_s12 = int_to_ptr.vmem [resolvable:$true] %s23_s12 }
   0x7   :  { %s639_s14 = smov 8   ;;  %s47_s16 = sshll.u32 %s746_s3, 4  ;;  %s48_s16 = int_to_ptr.hbm [resolvable:$true] %s47_s16 }
   0x8   :  { %29 = dma.hbm_to_vmem [thread:$0]  %s22_s8, 256, %s24_s12, [#allocation3], %s638_s13, %s638_s13, %s639_s14  }
   0x9   :  { %s640_s17 = smov [#allocation7]  }
   0xa   :  { %s49_s1 = sshll.u32 %s640_s17, 4  ;;  %s50_s1 = int_to_ptr.vmem [resolvable:$true] %s49_s1 }
   0xb   :  { %55 = dma.hbm_to_vmem [thread:$0]  %s48_s16, 6144, %s50_s1, [#allocation6], %s635_s9, %s635_s9, %s636_s10  }
   0xc   :  { %628 = dma.done.wait [#allocation3], 256  }
   0xd   :  { %629 = vsyncadd [#allocation3], 4294967040 }
   0xe   :  { %630 = dma.done.wait [#allocation6], 12288  }
   0xf   :  { %631 = vsyncadd [#allocation6], 4294955008  ;;  %v167_v0 = vld [vmem:[#allocation7 + $0x168] sm:$0xff]  ;;  %v168_v1 = vld [vmem:[#allocation7 + $0x170] sm:$0xff]  ;;  %s459_s27 = sshll.u32 %s750_s7, 4  ;;  %s460_s27 = int_to_ptr.hbm [resolvable:$true] %s459_s27 }
  0x10   :  { %v169_v2 = vld [vmem:[#allocation7 + $0x178] sm:$0xff]  ;;  %174 = vmatpush.msra.mxu0 %v167_v0  ;;  %197 = vmatpush.msra.mxu1 %v168_v1  ;;  %v119_v3 = vld [vmem:[#allocation5 + $0x168] sm:$0xff]  ;;  %v164_v4 = vld [vmem:[#allocation7 + $0x150] sm:$0xff] }
  0x11   :  { %v165_v5 = vld [vmem:[#allocation7 + $0x158] sm:$0xff]  ;;  %220 = vmatpush.msra.mxu2 %v169_v2  ;;  %243 = vmatpush.msra.mxu3 %v119_v3  ;;  %v166_v6 = vld [vmem:[#allocation7 + $0x160] sm:$0xff]  ;;  %v116_v7 = vld [vmem:[#allocation5 + $0x150] sm:$0xff] }
  0x12   :  { %v161_v8 = vld [vmem:[#allocation7 + $0x138] sm:$0xff]  ;;  %175 = vmatpush.msra.mxu0 %v164_v4  ;;  %198 = vmatpush.msra.mxu1 %v165_v5  ;;  %v162_v9 = vld [vmem:[#allocation7 + $0x140] sm:$0xff]  ;;  %v163_v10 = vld [vmem:[#allocation7 + $0x148] sm:$0xff] }
  0x13   :  { %v113_v11 = vld [vmem:[#allocation5 + $0x138] sm:$0xff]  ;;  %221 = vmatpush.msra.mxu2 %v166_v6  ;;  %244 = vmatpush.msra.mxu3 %v116_v7  ;;  %v158_v12 = vld [vmem:[#allocation7 + $0x120] sm:$0xff]  ;;  %v159_v13 = vld [vmem:[#allocation7 + $0x128] sm:$0xff] }
  0x14   :  { %176 = vmatpush.msra.mxu0 %v161_v8  ;;  %199 = vmatpush.msra.mxu1 %v162_v9  ;;  %v160_v14 = vld [vmem:[#allocation7 + $0x130] sm:$0xff]  ;;  %v110_v15 = vld [vmem:[#allocation5 + $0x120] sm:$0xff]  ;;  %v155_v16 = vld [vmem:[#allocation7 + $0x108] sm:$0xff] }
  0x15   :  { %222 = vmatpush.msra.mxu2 %v163_v10  ;;  %245 = vmatpush.msra.mxu3 %v113_v11  ;;  %v156_v17 = vld [vmem:[#allocation7 + $0x110] sm:$0xff]  ;;  %v157_v18 = vld [vmem:[#allocation7 + $0x118] sm:$0xff]  ;;  %v107_v19 = vld [vmem:[#allocation5 + $0x108] sm:$0xff] }
  0x16   :  { %177 = vmatpush.msra.mxu0 %v158_v12  ;;  %200 = vmatpush.msra.mxu1 %v159_v13  ;;  %v152_v20 = vld [vmem:[#allocation7 + $0xf0] sm:$0xff]  ;;  %v153_v21 = vld [vmem:[#allocation7 + $0xf8] sm:$0xff]  ;;  %v154_v22 = vld [vmem:[#allocation7 + $0x100] sm:$0xff] }
  0x17   :  { %223 = vmatpush.msra.mxu2 %v160_v14  ;;  %246 = vmatpush.msra.mxu3 %v110_v15  ;;  %v104_v23 = vld [vmem:[#allocation5 + $0xf0] sm:$0xff]  ;;  %v149_v24 = vld [vmem:[#allocation7 + $0xd8] sm:$0xff]  ;;  %v150_v25 = vld [vmem:[#allocation7 + $0xe0] sm:$0xff] }
  0x18   :  { %178 = vmatpush.msra.mxu0 %v155_v16  ;;  %201 = vmatpush.msra.mxu1 %v156_v17  ;;  %v151_v26 = vld [vmem:[#allocation7 + $0xe8] sm:$0xff]  ;;  %v101_v27 = vld [vmem:[#allocation5 + $0xd8] sm:$0xff]  ;;  %v146_v28 = vld [vmem:[#allocation7 + $0xc0] sm:$0xff] }
  0x19   :  { %224 = vmatpush.msra.mxu2 %v157_v18  ;;  %247 = vmatpush.msra.mxu3 %v107_v19  ;;  %v147_v29 = vld [vmem:[#allocation7 + $0xc8] sm:$0xff]  ;;  %v148_v30 = vld [vmem:[#allocation7 + $0xd0] sm:$0xff]  ;;  %v98_v31 = vld [vmem:[#allocation5 + $0xc0] sm:$0xff] }
  0x1a   :  { %179 = vmatpush.msra.mxu0 %v152_v20  ;;  %202 = vmatpush.msra.mxu1 %v153_v21  ;;  %v143_v32 = vld [vmem:[#allocation7 + $0xa8] sm:$0xff]  ;;  %v144_v33 = vld [vmem:[#allocation7 + $0xb0] sm:$0xff]  ;;  %v145_v34 = vld [vmem:[#allocation7 + $0xb8] sm:$0xff] }
  0x1b   :  { %225 = vmatpush.msra.mxu2 %v154_v22  ;;  %248 = vmatpush.msra.mxu3 %v104_v23  ;;  %v95_v35 = vld [vmem:[#allocation5 + $0xa8] sm:$0xff]  ;;  %v140_v36 = vld [vmem:[#allocation7 + $0x90] sm:$0xff]  ;;  %v141_v37 = vld [vmem:[#allocation7 + $0x98] sm:$0xff] }
  0x1c   :  { %180 = vmatpush.msra.mxu0 %v149_v24  ;;  %203 = vmatpush.msra.mxu1 %v150_v25  ;;  %v142_v38 = vld [vmem:[#allocation7 + $0xa0] sm:$0xff]  ;;  %v92_v39 = vld [vmem:[#allocation5 + $0x90] sm:$0xff]  ;;  %v137_v40 = vld [vmem:[#allocation7 + $0x78] sm:$0xff] }
  0x1d   :  { %226 = vmatpush.msra.mxu2 %v151_v26  ;;  %249 = vmatpush.msra.mxu3 %v101_v27  ;;  %v138_v41 = vld [vmem:[#allocation7 + $0x80] sm:$0xff]  ;;  %v139_v42 = vld [vmem:[#allocation7 + $0x88] sm:$0xff]  ;;  %v89_v43 = vld [vmem:[#allocation5 + $0x78] sm:$0xff] }
  0x1e   :  { %181 = vmatpush.msra.mxu0 %v146_v28  ;;  %204 = vmatpush.msra.mxu1 %v147_v29  ;;  %v134_v44 = vld [vmem:[#allocation7 + $0x60] sm:$0xff]  ;;  %v135_v45 = vld [vmem:[#allocation7 + $0x68] sm:$0xff]  ;;  %v136_v46 = vld [vmem:[#allocation7 + $0x70] sm:$0xff] }
  0x1f   :  { %227 = vmatpush.msra.mxu2 %v148_v30  ;;  %250 = vmatpush.msra.mxu3 %v98_v31  ;;  %v86_v47 = vld [vmem:[#allocation5 + $0x60] sm:$0xff]  ;;  %v131_v48 = vld [vmem:[#allocation7 + $0x48] sm:$0xff]  ;;  %v132_v49 = vld [vmem:[#allocation7 + $0x50] sm:$0xff] }
  0x20   :  { %182 = vmatpush.msra.mxu0 %v143_v32  ;;  %205 = vmatpush.msra.mxu1 %v144_v33  ;;  %v133_v50 = vld [vmem:[#allocation7 + $0x58] sm:$0xff]  ;;  %v83_v51 = vld [vmem:[#allocation5 + $0x48] sm:$0xff]  ;;  %v128_v52 = vld [vmem:[#allocation7 + $0x30] sm:$0xff] }
  0x21   :  { %228 = vmatpush.msra.mxu2 %v145_v34  ;;  %251 = vmatpush.msra.mxu3 %v95_v35  ;;  %v129_v53 = vld [vmem:[#allocation7 + $0x38] sm:$0xff]  ;;  %v130_v54 = vld [vmem:[#allocation7 + $0x40] sm:$0xff]  ;;  %v80_v55 = vld [vmem:[#allocation5 + $0x30] sm:$0xff] }
  0x22   :  { %183 = vmatpush.msra.mxu0 %v140_v36  ;;  %206 = vmatpush.msra.mxu1 %v141_v37  ;;  %v125_v56 = vld [vmem:[#allocation7 + $0x18] sm:$0xff]  ;;  %v126_v57 = vld [vmem:[#allocation7 + $0x20] sm:$0xff]  ;;  %v127_v58 = vld [vmem:[#allocation7 + $0x28] sm:$0xff] }
  0x23   :  { %229 = vmatpush.msra.mxu2 %v142_v38  ;;  %252 = vmatpush.msra.mxu3 %v92_v39  ;;  %v77_v59 = vld [vmem:[#allocation5 + $0x18] sm:$0xff]  ;;  %v122_v60 = vld [vmem:[#allocation7] sm:$0xff]  ;;  %v123_v61 = vld [vmem:[#allocation7 + $0x8] sm:$0xff] }
  0x24   :  { %184 = vmatpush.msra.mxu0 %v137_v40  ;;  %207 = vmatpush.msra.mxu1 %v138_v41  ;;  %v124_v62 = vld [vmem:[#allocation7 + $0x10] sm:$0xff]  ;;  %v74_v63 = vld [vmem:[#allocation5] sm:$0xff]  ;;  %v121_v1 = vld [vmem:[#allocation5 + $0x178] sm:$0xff] }
  0x25   :  { %230 = vmatpush.msra.mxu2 %v139_v42  ;;  %253 = vmatpush.msra.mxu3 %v89_v43  ;;  %v120_v0 = vld [vmem:[#allocation5 + $0x170] sm:$0xff]  ;;  %v117_v2 = vld [vmem:[#allocation5 + $0x158] sm:$0xff]  ;;  %v118_v3 = vld [vmem:[#allocation5 + $0x160] sm:$0xff] }
  0x26   :  { %185 = vmatpush.msra.mxu0 %v134_v44  ;;  %208 = vmatpush.msra.mxu1 %v135_v45  ;;  %v114_v4 = vld [vmem:[#allocation5 + $0x140] sm:$0xff]  ;;  %v115_v5 = vld [vmem:[#allocation5 + $0x148] sm:$0xff]  ;;  %v112_v7 = vld [vmem:[#allocation5 + $0x130] sm:$0xff] }
  0x27   :  { %231 = vmatpush.msra.mxu2 %v136_v46  ;;  %254 = vmatpush.msra.mxu3 %v86_v47  ;;  %v111_v6 = vld [vmem:[#allocation5 + $0x128] sm:$0xff]  ;;  %v108_v8 = vld [vmem:[#allocation5 + $0x110] sm:$0xff]  ;;  %v109_v9 = vld [vmem:[#allocation5 + $0x118] sm:$0xff] }
  0x28   :  { %186 = vmatpush.msra.mxu0 %v131_v48  ;;  %209 = vmatpush.msra.mxu1 %v132_v49  ;;  %v698_v10 = vld [vmem:[%s743_s0] sm:$0xff]  ;;  %v105_v11 = vld [vmem:[#allocation5 + $0xf8] sm:$0xff]  ;;  %v106_v12 = vld [vmem:[#allocation5 + $0x100] sm:$0xff] }
  0x29   :  { %232 = vmatpush.msra.mxu2 %v133_v50  ;;  %255 = vmatpush.msra.mxu3 %v83_v51  ;;  %v102_v13 = vld [vmem:[#allocation5 + $0xe0] sm:$0xff]  ;;  %v103_v14 = vld [vmem:[#allocation5 + $0xe8] sm:$0xff]  ;;  %v100_v16 = vld [vmem:[#allocation5 + $0xd0] sm:$0xff] }
  0x2a   :  { %187 = vmatpush.msra.mxu0 %v128_v52  ;;  %210 = vmatpush.msra.mxu1 %v129_v53  ;;  %v99_v15 = vld [vmem:[#allocation5 + $0xc8] sm:$0xff]  ;;  %v701_v17 = vld [vmem:[#allocation2] sm:$0xff]  ;;  %v97_v19 = vld [vmem:[#allocation5 + $0xb8] sm:$0xff] }
  0x2b   :  { %233 = vmatpush.msra.mxu2 %v130_v54  ;;  %256 = vmatpush.msra.mxu3 %v80_v55  ;;  %v96_v18 = vld [vmem:[#allocation5 + $0xb0] sm:$0xff]  ;;  %v173_v20 = vld [vmem:[%s743_s0 + $0x8] sm:$0xff]  ;;  %v94_v22 = vld [vmem:[#allocation5 + $0xa0] sm:$0xff] }
  0x2c   :  { %188 = vmatpush.msra.mxu0 %v125_v56  ;;  %211 = vmatpush.msra.mxu1 %v126_v57  ;;  %v93_v21 = vld [vmem:[#allocation5 + $0x98] sm:$0xff]  ;;  %v90_v23 = vld [vmem:[#allocation5 + $0x80] sm:$0xff]  ;;  %v91_v24 = vld [vmem:[#allocation5 + $0x88] sm:$0xff] }
  0x2d   :  { %234 = vmatpush.msra.mxu2 %v127_v58  ;;  %257 = vmatpush.msra.mxu3 %v77_v59  ;;  %v87_v25 = vld [vmem:[#allocation5 + $0x68] sm:$0xff]  ;;  %v88_v26 = vld [vmem:[#allocation5 + $0x70] sm:$0xff]  ;;  %v709_v27 = vld [vmem:[#allocation2 + $0x8] sm:$0xff] }
  0x2e   :  { %189 = vmatpush.msra.mxu0 %v122_v60  ;;  %212 = vmatpush.msra.mxu1 %v123_v61  ;;  %v84_v28 = vld [vmem:[#allocation5 + $0x50] sm:$0xff]  ;;  %v85_v29 = vld [vmem:[#allocation5 + $0x58] sm:$0xff]  ;;  %v82_v31 = vld [vmem:[#allocation5 + $0x40] sm:$0xff] }
  0x2f   :  { %235 = vmatpush.msra.mxu2 %v124_v62  ;;  %258 = vmatpush.msra.mxu3 %v74_v63  ;;  %v81_v30 = vld [vmem:[#allocation5 + $0x38] sm:$0xff]  ;;  %v78_v32 = vld [vmem:[#allocation5 + $0x20] sm:$0xff]  ;;  %v79_v33 = vld [vmem:[#allocation5 + $0x28] sm:$0xff] }
  0x30   :  { %266 = vmatpush.msrb.mxu0 %v120_v0  ;;  %289 = vmatpush.msrb.mxu1 %v121_v1  ;;  %v75_v34 = vld [vmem:[#allocation5 + $0x8] sm:$0xff]  ;;  %v76_v35 = vld [vmem:[#allocation5 + $0x10] sm:$0xff] }
  0x31   :  { %473 = vmatpush.msrb.mxu2 %v120_v0  ;;  %489 = vmatpush.msrb.mxu3 %v121_v1  ;;  %v312_v42 = vld [vmem:[%s747_s4] sm:$0x7] }
  0x32   :  { %267 = vmatpush.msrb.mxu0 %v117_v2  ;;  %290 = vmatpush.msrb.mxu1 %v118_v3  ;;  %v314_v45 = vperm.slane %v312_v42, 0  ;;  %v315_v47 = vperm.slane %v312_v42, 1  ;;  %v316_v51 = vperm.slane %v312_v42, 2 }
  0x33   :  { %474 = vmatpush.msrb.mxu2 %v117_v2  ;;  %490 = vmatpush.msrb.mxu3 %v118_v3 }
  0x34   :  { %268 = vmatpush.msrb.mxu0 %v114_v4  ;;  %291 = vmatpush.msrb.mxu1 %v115_v5 }
  0x35   :  { %475 = vmatpush.msrb.mxu2 %v114_v4  ;;  %491 = vmatpush.msrb.mxu3 %v115_v5  ;;  %v641_v4 = vmov 384.0  }
  0x36   :  { %269 = vmatpush.msrb.mxu0 %v111_v6  ;;  %292 = vmatpush.msrb.mxu1 %v112_v7  ;;  %514 = vrcp.f32 %v641_v4 }
  0x37   :  { %476 = vmatpush.msrb.mxu2 %v111_v6  ;;  %492 = vmatpush.msrb.mxu3 %v112_v7 }
  0x38   :  { %270 = vmatpush.msrb.mxu0 %v108_v8  ;;  %293 = vmatpush.msrb.mxu1 %v109_v9 }
  0x39   :  { %477 = vmatpush.msrb.mxu2 %v108_v8  ;;  %493 = vmatpush.msrb.mxu3 %v109_v9 }
  0x3a   :  { %259 = vmatmul.f32.vlgmr.msra.gmra.mxu3 %v698_v10  ;;  %271 = vmatpush.msrb.mxu0 %v105_v11 }
  0x3b   :  { %478 = vmatpush.msrb.mxu2 %v105_v11  ;;  %294 = vmatpush.msrb.mxu1 %v106_v12 }
  0x3c   :  { %494 = vmatpush.msrb.mxu3 %v106_v12  ;;  %272 = vmatpush.msrb.mxu0 %v102_v13  ;;  %v515_v5 = vpop.eup %514 }
  0x3d   :  { %479 = vmatpush.msrb.mxu2 %v102_v13  ;;  %295 = vmatpush.msrb.mxu1 %v103_v14  ;;  %v335_v6 = vmul.f32 384.0, %v515_v5  ;;  %vm339_vm0 = vweird.f32 %v515_v5 }
  0x3e   :  { %495 = vmatpush.msrb.mxu3 %v103_v14  ;;  %273 = vmatpush.msrb.mxu0 %v99_v15 }
  0x3f   :  { %480 = vmatpush.msrb.mxu2 %v99_v15  ;;  %296 = vmatpush.msrb.mxu1 %v100_v16  ;;  %v336_v7 = vsub.f32 1.0, %v335_v6 }
  0x40   :  { %496 = vmatpush.msrb.mxu3 %v100_v16  ;;  %190 = vmatmul.f32.vlgmr.msra.gmra.mxu0 %v701_v17 }
  0x41   :  { %213 = vmatmul.f32.vlgmr.msra.gmra.mxu1 %v701_v17  ;;  %236 = vmatmul.f32.vlgmr.msra.gmra.mxu2 %v701_v17  ;;  %v337_v8 = vmul.f32 %v515_v5, %v336_v7 }
  0x42   :  { %274 = vmatpush.msrb.mxu0 %v96_v18  ;;  %481 = vmatpush.msrb.mxu2 %v96_v18 }
  0x43   :  { %297 = vmatpush.msrb.mxu1 %v97_v19  ;;  %497 = vmatpush.msrb.mxu3 %v97_v19  ;;  %v338_v9 = vadd.f32 %v515_v5, %v337_v8 }
  0x44   :  { %262 = vmatmul.f32.gmra.mxu3 %v173_v20  ;;  %275 = vmatpush.msrb.mxu0 %v93_v21 }
  0x45   :  { %482 = vmatpush.msrb.mxu2 %v93_v21  ;;  %298 = vmatpush.msrb.mxu1 %v94_v22 }
  0x46   :  { %498 = vmatpush.msrb.mxu3 %v94_v22  ;;  %276 = vmatpush.msrb.mxu0 %v90_v23 }
  0x47   :  { %483 = vmatpush.msrb.mxu2 %v90_v23  ;;  %299 = vmatpush.msrb.mxu1 %v91_v24 }
  0x48   :  { %499 = vmatpush.msrb.mxu3 %v91_v24  ;;  %277 = vmatpush.msrb.mxu0 %v87_v25 }
  0x49   :  { %484 = vmatpush.msrb.mxu2 %v87_v25  ;;  %300 = vmatpush.msrb.mxu1 %v88_v26 }
  0x4a   :  { %500 = vmatpush.msrb.mxu3 %v88_v26  ;;  %193 = vmatmul.f32.gmra.mxu0 %v709_v27 }
  0x4b   :  { %216 = vmatmul.f32.gmra.mxu1 %v709_v27  ;;  %239 = vmatmul.f32.gmra.mxu2 %v709_v27 }
  0x4c   :  { %278 = vmatpush.msrb.mxu0 %v84_v28  ;;  %485 = vmatpush.msrb.mxu2 %v84_v28 }
  0x4d   :  { %301 = vmatpush.msrb.mxu1 %v85_v29  ;;  %501 = vmatpush.msrb.mxu3 %v85_v29 }
  0x4e   :  { %279 = vmatpush.msrb.mxu0 %v81_v30  ;;  %486 = vmatpush.msrb.mxu2 %v81_v30 }
  0x4f   :  { %302 = vmatpush.msrb.mxu1 %v82_v31  ;;  %502 = vmatpush.msrb.mxu3 %v82_v31 }
  0x50   :  { %280 = vmatpush.msrb.mxu0 %v78_v32  ;;  %487 = vmatpush.msrb.mxu2 %v78_v32 }
  0x51   :  { %303 = vmatpush.msrb.mxu1 %v79_v33  ;;  %503 = vmatpush.msrb.mxu3 %v79_v33 }
  0x52   :  { %281 = vmatpush.msrb.mxu0 %v75_v34  ;;  %488 = vmatpush.msrb.mxu2 %v75_v34 }
  0x53   :  { %304 = vmatpush.msrb.mxu1 %v76_v35  ;;  %504 = vmatpush.msrb.mxu3 %v76_v35 }
  0x54   :  { %282 = vmatmul.f32.vlgmr.msrb.gmra.mxu0 %v698_v10  ;;  %285 = vmatmul.f32.vlgmr.msrb.gmra.mxu2 %v173_v20 }
  0x55   :  { %305 = vmatmul.f32.vlgmr.msrb.gmra.mxu1 %v698_v10  ;;  %308 = vmatmul.f32.vlgmr.msrb.gmra.mxu3 %v173_v20  ;;  %v340_v10 = vsel %vm339_vm0, %v515_v5, %v338_v9 }
  0xbd   :  { %v191_v36 = vpop.f32.mrf.mxu0  ;;  %v260_v39 = vpop.f32.mrf.mxu3 }
  0xbe   :  { %v214_v37 = vpop.f32.mrf.mxu1  ;;  %v261_v44 = vadd.f32 %v260_v39, %v191_v36 }
  0xc0   :  { %v320_v53 = vadd.f32 %v314_v45, %v261_v44 }
  0xc4   :  { %v237_v38 = vpop.f32.mrf.mxu2 }
  0xc7   :  { %v194_v40 = vpop.f32.mrf.mxu0  ;;  %v263_v46 = vpop.f32.mrf.mxu3 }
  0xc8   :  { %v217_v41 = vpop.f32.mrf.mxu1  ;;  %v264_v55 = vadd.f32 %v263_v46, %v194_v40  ;;  %v407_v46 = vld [vmem:[%s749_s6] sm:$0x7] }
  0xca   :  { %v323_v62 = vadd.f32 %v314_v45, %v264_v55 }
  0xce   :  { %v240_v43 = vpop.f32.mrf.mxu2 }
  0xd1   :  { %v283_v48 = vpop.f32.mrf.mxu0 }
  0xd2   :  { %v284_v49 = vadd.f32 %v283_v48, %v214_v37  ;;  %v306_v50 = vpop.f32.mrf.mxu1 }
  0xd3   :  { %v307_v52 = vadd.f32 %v306_v50, %v237_v38 }
  0xd4   :  { %v321_v54 = vadd.f32 %v315_v47, %v284_v49 }
  0xd5   :  { %v322_v56 = vadd.f32 %v316_v51, %v307_v52 }
  0xd6   :  { %v326_v57 = vadd.f32 %v321_v54, %v320_v53 }
  0xd7   :  { %v286_v58 = vpop.f32.mrf.mxu2 }
  0xd8   :  { %v287_v59 = vadd.f32 %v286_v58, %v217_v41  ;;  %v309_v60 = vpop.f32.mrf.mxu3  ;;  %v327_v61 = vadd.f32 %v326_v57, %v322_v56 }
  0xd9   :  { %v310_v0 = vadd.f32 %v309_v60, %v240_v43  ;;  %v393_v43 = vld [vmem:[%s748_s5] sm:$0x7]  ;;  %s642_s5 = smov [#allocation8]  }
  0xda   :  { %v324_v63 = vadd.f32 %v315_v47, %v287_v59  ;;  %328 = vadd.xlane.f32.xlu0 %v327_v61  ;;  %v395_v49 = vperm.slane %v393_v43, 0  ;;  %v397_v50 = vperm.slane %v393_v43, 2  ;;  %v396_v5 = vperm.slane %v393_v43, 1  ;;  %s457_s6 = sshll.u32 %s642_s5, 4  ;;  %s458_s6 = int_to_ptr.vmem [resolvable:$true] %s457_s6 }
  0xdb   :  { %v325_v2 = vadd.f32 %v316_v51, %v310_v0 }
  0xdc   :  { %v330_v1 = vadd.f32 %v324_v63, %v323_v62 }
  0xde   :  { %v331_v3 = vadd.f32 %v330_v1, %v325_v2 }
  0xe2   :  { %332 = vadd.xlane.f32.xlu0 %v331_v3 }
 0x14d   :  { %v329_v11 = vpop.xlane.xlu0 %328 }
 0x14e   :  { %v341_v12 = vmul.f32 %v340_v10, %v329_v11 }
 0x150   :  { %v343_v13 = vsub.f32 %v320_v53, %v341_v12  ;;  %v719_v14 = vsub.f32 %v321_v54, %v341_v12  ;;  %v345_v15 = vsub.f32 %v322_v56, %v341_v12  ;;  %v409_v53 = vperm.slane %v407_v46, 0 }
 0x151   :  { %v411_v54 = vperm.slane %v407_v46, 2  ;;  %v410_v12 = vperm.slane %v407_v46, 1 }
 0x152   :  { %v349_v16 = vmul.f32 %v343_v13, %v343_v13  ;;  %v350_v18 = vmul.f32 %v719_v14, %v719_v14  ;;  %v351_v19 = vmul.f32 %v345_v15, %v345_v15 }
 0x154   :  { %v355_v20 = vadd.f32 %v350_v18, %v349_v16 }
 0x155   :  { %v333_v21 = vpop.xlane.xlu0 %332 }
 0x156   :  { %v342_v22 = vmul.f32 %v340_v10, %v333_v21  ;;  %v356_v23 = vadd.f32 %v355_v20, %v351_v19 }
 0x158   :  { %v346_v24 = vsub.f32 %v323_v62, %v342_v22  ;;  %v723_v25 = vsub.f32 %v324_v63, %v342_v22  ;;  %v348_v26 = vsub.f32 %v325_v2, %v342_v22  ;;  %357 = vadd.xlane.f32.xlu1 %v356_v23 }
 0x15a   :  { %v352_v28 = vmul.f32 %v346_v24, %v346_v24  ;;  %v353_v29 = vmul.f32 %v723_v25, %v723_v25  ;;  %v354_v30 = vmul.f32 %v348_v26, %v348_v26 }
 0x15c   :  { %v359_v31 = vadd.f32 %v353_v29, %v352_v28 }
 0x15e   :  { %v360_v32 = vadd.f32 %v359_v31, %v354_v30 }
 0x160   :  { %361 = vadd.xlane.f32.xlu1 %v360_v32 }
 0x1cb   :  { %v358_v33 = vpop.xlane.xlu1 %357 }
 0x1cc   :  { %v363_v34 = vmul.f32 %v358_v33, %v340_v10 }
 0x1ce   :  { %v365_v35 = vadd.f32 1e-05, %v363_v34 }
 0x1d0   :  { %516 = vrsqrt.f32 %v365_v35  ;;  %vm373_vm2 = vweird.f32 %v365_v35 }
 0x1d3   :  { %v362_v36 = vpop.xlane.xlu1 %361 }
 0x1d4   :  { %v364_v37 = vmul.f32 %v362_v36, %v340_v10 }
 0x1d6   :  { %v517_v38 = vpop.eup %516  ;;  %v366_v39 = vadd.f32 1e-05, %v364_v37 }
 0x1d7   :  { %v368_v40 = vmul.f32 %v517_v38, %v365_v35  ;;  %vm374_vm1 = vweird.f32 %v517_v38 }
 0x1d8   :  { %518 = vrsqrt.f32 %v366_v39  ;;  %vm375_vm3 = vmor %vm373_vm2, %vm374_vm1  ;;  %vm383_vm5 = vweird.f32 %v366_v39 }
 0x1d9   :  { %v369_v41 = vmul.f32 %v517_v38, %v368_v40 }
 0x1db   :  { %v370_v42 = vmul.f32 0.5, %v369_v41 }
 0x1dd   :  { %v371_v44 = vsub.f32 1.5, %v370_v42 }
 0x1de   :  { %v519_v45 = vpop.eup %518 }
 0x1df   :  { %v372_v47 = vmul.f32 %v517_v38, %v371_v44  ;;  %v378_v48 = vmul.f32 %v519_v45, %v366_v39  ;;  %vm384_vm4 = vweird.f32 %v519_v45 }
 0x1e0   :  { %vm385_vm6 = vmor %vm383_vm5, %vm384_vm4 }
 0x1e1   :  { %v376_v51 = vsel %vm375_vm3, %v517_v38, %v372_v47  ;;  %v379_v52 = vmul.f32 %v519_v45, %v378_v48 }
 0x1e2   :  { %v387_v55 = vmul.f32 %v376_v51, %v343_v13  ;;  %v389_v56 = vmul.f32 %v376_v51, %v345_v15  ;;  %v388_v6 = vmul.f32 %v376_v51, %v719_v14 }
 0x1e3   :  { %v380_v57 = vmul.f32 0.5, %v379_v52 }
 0x1e4   :  { %v401_v58 = vmul.f32 %v395_v49, %v387_v55  ;;  %v403_v59 = vmul.f32 %v397_v50, %v389_v56  ;;  %v402_v13 = vmul.f32 %v396_v5, %v388_v6 }
 0x1e5   :  { %v381_v60 = vsub.f32 1.5, %v380_v57 }
 0x1e6   :  { %v415_v61 = vadd.f32 %v409_v53, %v401_v58  ;;  %v417_v62 = vadd.f32 %v411_v54, %v403_v59  ;;  %v416_v22 = vadd.f32 %v410_v12, %v402_v13 }
 0x1e7   :  { %v382_v63 = vmul.f32 %v519_v45, %v381_v60 }
 0x1e8   :  { %v421_v0 = vmul.f32 0.5, %v415_v61  ;;  %v433_v1 = vadd.f32 -1.0, %v417_v62 }
 0x1e9   :  { %v386_v2 = vsel %vm385_vm6, %v519_v45, %v382_v63 }
 0x1ea   :  { %520 = vtanh.f32 %v421_v0  ;;  %v390_v3 = vmul.f32 %v386_v2, %v346_v24  ;;  %v392_v4 = vmul.f32 %v386_v2, %v348_v26  ;;  %v435_v7 = vmul.f32 0.5, %v433_v1 }
 0x1eb   :  { %v391_v24 = vmul.f32 %v386_v2, %v723_v25 }
 0x1ec   :  { %v404_v8 = vmul.f32 %v395_v49, %v390_v3  ;;  %v406_v9 = vmul.f32 %v397_v50, %v392_v4  ;;  %522 = vtanh.f32 %v435_v7 }
 0x1ed   :  { %v405_v29 = vmul.f32 %v396_v5, %v391_v24 }
 0x1ee   :  { %v418_v10 = vadd.f32 %v409_v53, %v404_v8  ;;  %v420_v11 = vadd.f32 %v411_v54, %v406_v9 }
 0x1ef   :  { %v419_v34 = vadd.f32 %v410_v12, %v405_v29 }
 0x1f0   :  { %v521_v15 = vpop.eup %520  ;;  %v422_v16 = vmul.f32 0.5, %v418_v10  ;;  %v434_v18 = vadd.f32 -1.0, %v420_v11 }
 0x1f1   :  { %v425_v19 = vadd.f32 1.0, %v521_v15 }
 0x1f2   :  { %524 = vtanh.f32 %v422_v16  ;;  %v436_v20 = vmul.f32 0.5, %v434_v18  ;;  %v523_v21 = vpop.eup %522 }
 0x1f3   :  { %v427_v23 = vmul.f32 0.5, %v425_v19  ;;  %v439_v14 = vadd.f32 1.0, %v523_v21 }
 0x1f4   :  { %526 = vtanh.f32 %v436_v20 }
 0x1f5   :  { %v429_v26 = vmul.f32 %v427_v23, %v416_v22  ;;  %v441_v28 = vmul.f32 0.5, %v439_v14 }
 0x1f7   :  { %528 = vtanh.f32 %v429_v26  ;;  %v445_v33 = vsub.f32 1.0, %v441_v28 }
 0x1f8   :  { %v525_v30 = vpop.eup %524 }
 0x1f9   :  { %v426_v31 = vadd.f32 1.0, %v525_v30  ;;  %v447_v41 = vmul.f32 %v445_v33, %v701_v17 }
 0x1fa   :  { %v527_v32 = vpop.eup %526 }
 0x1fb   :  { %v428_v35 = vmul.f32 0.5, %v426_v31  ;;  %v440_v36 = vadd.f32 1.0, %v527_v32 }
 0x1fd   :  { %v529_v37 = vpop.eup %528  ;;  %v430_v38 = vmul.f32 %v428_v35, %v419_v34  ;;  %v442_v39 = vmul.f32 0.5, %v440_v36 }
 0x1fe   :  { %v443_v40 = vmul.f32 %v529_v37, %v441_v28 }
 0x1ff   :  { %530 = vtanh.f32 %v430_v38  ;;  %v446_v42 = vsub.f32 1.0, %v442_v39 }
 0x200   :  { %v449_v25 = vadd.f32 %v447_v41, %v443_v40 }
 0x201   :  { %v448_v45 = vmul.f32 %v446_v42, %v709_v27 }
 0x202   :  { %451 = vst [vmem:[#allocation8] sm:$0xff] %v449_v25 }
 0x205   :  { %v531_v43 = vpop.eup %530 }
 0x206   :  { %v444_v44 = vmul.f32 %v531_v43, %v442_v39 }
 0x208   :  { %v450_v46 = vadd.f32 %v448_v45, %v444_v44 }
 0x20a   :  { %452 = vst [vmem:[#allocation8 + $0x8] sm:$0xff] %v450_v46 }
 0x20b   :  { %465 = dma.vmem_to_hbm [thread:$0]  %s458_s6, 256, %s460_s27, [#allocation4], %s638_s13, %s638_s13, %s639_s14  }
 0x20c   :  { %632 = dma.done.wait [#allocation4], 256  }
 0x20d   :  { %633 = vsyncadd [#allocation4], 4294967040 }
 0x20e   :  { %470 = vsyncpa [#allocation3], 1 }
 0x20f   :  { %471 = vsyncpa [#allocation6], 1 }
 0x210   :  { %472 = vsyncpa [#allocation4], 1 }

</bundles_post_ra>
